<compile_context>
chip_gen: v5e
topology: v5e:2x2
jax: 0.10.0
libtpu: 0.0.40
codegen_flags: <defaults>
</compile_context>

<pallas_src>
import jax
import jax.numpy as jnp
import numpy as np
from jax.experimental import pallas as pl
from jax.experimental.pallas import tpu as pltpu


def _round_up(x, m):
    return ((x + m - 1) // m) * m


# --------------------------------------------------------------------------------------
# Kernel
# --------------------------------------------------------------------------------------
def _bsconvu_kernel(x_top_ref, x_mid_ref, x_bot_ref, wpw_ref, wdw_ref, b_ref,
                    o_ref, mid_ref):
    # x_top_ref: (1, 1,  W, Cin)  halo row above the strip (clamped; masked at image top)
    # x_mid_ref: (1, TH, W, Cin)  core rows of the strip
    # x_bot_ref: (1, 1,  W, Cin)  halo row below the strip (clamped; masked at image bottom)
    # wpw_ref  : (Cin, TC)        pointwise weight tile
    # wdw_ref  : (9, TC)          depthwise 3x3 weight tile, taps flattened as kh*3+kw
    # b_ref    : (1, TC)          depthwise bias tile
    # o_ref    : (1, TH, W, TC)   output strip
    # mid_ref  : (TH+2, W, TC)    f32 VMEM scratch holding the pointwise result (+halo rows)
    _, TH, W, Cin = x_mid_ref.shape
    TC = o_ref.shape[-1]
    f32 = jnp.float32

    t = pl.program_id(1)
    nt = pl.num_programs(1)
    # Image-boundary zero padding: the clamped halo rows duplicate a valid row; the
    # pointwise stage is strictly linear (no bias / activation), so scaling its input
    # to 0 reproduces the zero pad exactly.  (Do NOT add a pointwise bias here.)
    top_scale = (t > 0).astype(x_mid_ref.dtype)
    bot_scale = (t < nt - 1).astype(x_mid_ref.dtype)

    wpw = wpw_ref[...]                                            # (Cin, TC)

    # ---- pointwise 1x1 conv == channel matmul (MXU, f32 accumulate) ----
    # Results go straight into the (TH+2, W, TC) f32 scratch (no input-side concat copy);
    # the three vertical taps become aligned static row slices of this scratch.
    mid_ref[1:TH + 1] = jnp.dot(
        x_mid_ref[0].reshape(TH * W, Cin), wpw, preferred_element_type=f32
    ).reshape(TH, W, TC)
    mid_ref[0] = jnp.dot(
        (x_top_ref[0] * top_scale).reshape(W, Cin), wpw, preferred_element_type=f32)
    mid_ref[TH + 1] = jnp.dot(
        (x_bot_ref[0] * bot_scale).reshape(W, Cin), wpw, preferred_element_type=f32)

    # ---- depthwise 3x3, stride 1, zero pad 1 ----
    # W-shifted taps via pltpu.roll (XLU slot — no materialized shifted strips); the
    # wrapped boundary column is killed by folding a 0/1 mask into the tap weight, so the
    # per-tap VPU work stays at one FMA.
    col = jax.lax.broadcasted_iota(jnp.int32, (1, W, 1), 1)
    not_first = (col > 0).astype(f32)        # zero at w == 0     (left zero pad)
    not_last = (col < W - 1).astype(f32)     # zero at w == W - 1 (right zero pad)

    wdw = wdw_ref[...].astype(f32)           # (9, TC): one load, hoisted out of the loop
    acc = b_ref[...].astype(f32).reshape(1, 1, TC)   # bias fused into the first FMA
    for i in range(3):                       # kh
        rows = mid_ref[i:i + TH]             # (TH, W, TC) aligned slice of the scratch
        for j in range(3):                   # kw
            tap = wdw[3 * i + j].reshape(1, 1, TC)
            if j == 0:
                v = pltpu.roll(rows, 1, 1)           # v[:, w] = rows[:, w-1]
                tap = tap * not_first                # (1, W, TC) masked tap
            elif j == 2:
                v = pltpu.roll(rows, W - 1, 1)       # v[:, w] = rows[:, w+1]
                tap = tap * not_last
            else:
                v = rows
            acc = acc + v * tap              # f32 FMAs (v5e-safe)

    o_ref[0] = acc.astype(o_ref.dtype)


# --------------------------------------------------------------------------------------
# VMEM sizing helpers (generation-aware, (8,128)-layout-aware)
# --------------------------------------------------------------------------------------
def _block_vmem_bytes(shape, itemsize):
    """VMEM footprint of one block under (sublane, lane) tiled layout."""
    sub = 8 * max(1, 4 // itemsize)          # 8 for f32, 16 for bf16, 32 for int8
    dims = list(shape)
    dims[-1] = _round_up(dims[-1], 128)
    if len(dims) >= 2:
        dims[-2] = _round_up(dims[-2], sub)
    n = 1
    for d in dims:
        n *= d
    return n * itemsize


def _estimate_step_vmem(TH, W, Cin, TC, x_itemsize):
    """Per-grid-step VMEM working set: double-buffered pipeline blocks + persistent f32
    scratch + in-kernel f32 temporaries, with layout padding modelled."""
    est = 0
    est += 2 * _block_vmem_bytes((1, TH, W, Cin), x_itemsize)       # core input strip
    est += 2 * 2 * _block_vmem_bytes((1, 1, W, Cin), x_itemsize)    # two halo-row blocks
    est += 2 * _block_vmem_bytes((1, TH, W, TC), x_itemsize)        # output strip
    est += 2 * (_block_vmem_bytes((Cin, TC), x_itemsize)
                + _block_vmem_bytes((9, TC), x_itemsize)
                + _block_vmem_bytes((1, TC), x_itemsize))           # weight / bias tiles
    est += _block_vmem_bytes((TH + 2, W, TC), 4)                    # f32 pointwise scratch
    est += 3 * _block_vmem_bytes((TH, W, TC), 4)                    # acc + rolled tap + slack
    return est


def _vmem_budget_and_limit():
    """~3/8 of physical VMEM as per-step budget, ~3/4 as the compiler limit
    (128 MiB -> 48/96 MiB on v5e/v6e; 64 MiB -> 24/48 MiB on v7x)."""
    try:
        cap = int(pltpu.get_tpu_info().vmem_capacity_bytes)
    except Exception:
        cap = 64 << 20                                              # conservative fallback
    return (cap * 3) // 8, (cap * 3) // 4


def _device_kind():
    try:
        return jax.devices()[0].device_kind.lower()
    except Exception:
        return ""


def _pick_tile_h(H, W, Cin, TC, x_itemsize, budget):
    """Largest divisor of H whose per-step working set fits the budget."""
    # TODO(synk): lift the 'divides H' restriction (remainder tile with a short write) so
    # awkward / prime H does not degrade to tiny strips.
    best = 1
    for th in range(1, H + 1):
        if H % th:
            continue
        if _estimate_step_vmem(th, W, Cin, TC, x_itemsize) <= budget:
            best = th
    return best


# --------------------------------------------------------------------------------------
# Wrappers
# --------------------------------------------------------------------------------------
def bsconvu_pallas_nhwc(x, w_pw, w_dw, b_dw, *, tile_h=None, tile_cout=None):
    """BSConvU (1x1 pointwise conv -> 3x3 depthwise conv, stride 1, pad 1, bias), NHWC.

    x: (N, H, W, Cin); w_pw: (Cout, Cin, 1, 1); w_dw: (Cout, 1, 3, 3); b_dw: (Cout,).
    Returns (N, H, W, Cout).  W that is a multiple of 8 avoids sublane relayouts (perf only).
    """
    N, H, W, Cin = x.shape
    Cout = w_pw.shape[0]
    x_itemsize = jnp.dtype(x.dtype).itemsize
    budget, vmem_limit = _vmem_budget_and_limit()

    # ---- Cout tiling: lane-dense (>=128) tiles; pad Cout when it isn't a 128 multiple
    # (lane-sparse output blocks force masked vst.msk partial stores).
    if tile_cout is None:
        tile_cout = 128
        # 256-wide MXU on v6e/v7x; keep 128 on v5e (4x128^2 MXUs) and whenever the bigger
        # Cout tile would crush TH under the VMEM budget (v7x, 64 MiB).
        if Cout % 256 == 0 and "v5" not in _device_kind():
            if _pick_tile_h(H, W, Cin, 256, x_itemsize, budget) >= min(H, 16):
                tile_cout = 256
    TC = tile_cout
    Cp = _round_up(Cout, TC)

    # ---- H tiling ----
    if tile_h is None:
        tile_h = _pick_tile_h(H, W, Cin, TC, x_itemsize, budget)
        # keep >= 2 parallel grid steps so v7x's second TensorCore gets work
        if N == 1 and Cp // TC == 1 and tile_h == H and H > 1:
            for th in range(H // 2, 0, -1):
                if H % th == 0:
                    tile_h = th
                    break
    if H % tile_h != 0:
        raise ValueError(f"tile_h={tile_h} must divide H={H}")
    TH = tile_h
    n_ht, n_ct = H // TH, Cp // TC

    # ---- weights -> (Cin, Cp), (9, Cp), (1, Cp); zero-pad the Cout axis if needed ----
    wpw = jnp.transpose(w_pw.reshape(Cout, Cin), (1, 0))
    wdw = jnp.transpose(w_dw.reshape(Cout, 9), (1, 0))
    bias = b_dw.reshape(1, Cout)
    if Cp != Cout:
        wpw = jnp.pad(wpw, ((0, 0), (0, Cp - Cout)))
        wdw = jnp.pad(wdw, ((0, 0), (0, Cp - Cout)))
        bias = jnp.pad(bias, ((0, 0), (0, Cp - Cout)))
    wpw = wpw.astype(x.dtype)
    wdw = wdw.astype(x.dtype)
    bias = bias.astype(x.dtype)

    # TODO(synk): for deep-channel / small-spatial layers (Cin*Cout >> n_ct*H*W*Cin) flip the
    # grid to (N, n_ct, n_ht) so weight tiles stay resident across the H sweep.
    out = pl.pallas_call(
        _bsconvu_kernel,
        out_shape=jax.ShapeDtypeStruct((N, H, W, Cp), x.dtype),
        grid_spec=pltpu.PrefetchScalarGridSpec(
            num_scalar_prefetch=0,
            grid=(N, n_ht, n_ct),
            in_specs=[
                # halo row above the strip (H-block size 1 -> block index == row index)
                pl.BlockSpec((1, 1, W, Cin),
                             lambda n, t, c: (n, jnp.maximum(t * TH - 1, 0), 0, 0)),
                # core strip
                pl.BlockSpec((1, TH, W, Cin), lambda n, t, c: (n, t, 0, 0)),
                # halo row below the strip
                pl.BlockSpec((1, 1, W, Cin),
                             lambda n, t, c: (n, jnp.minimum((t + 1) * TH, H - 1), 0, 0)),
                pl.BlockSpec((Cin, TC), lambda n, t, c: (0, c)),
                pl.BlockSpec((9, TC), lambda n, t, c: (0, c)),
                pl.BlockSpec((1, TC), lambda n, t, c: (0, c)),
            ],
            out_specs=pl.BlockSpec((1, TH, W, TC), lambda n, t, c: (n, t, 0, c)),
            scratch_shapes=[pltpu.VMEM((TH + 2, W, TC), jnp.float32)],
        ),
        compiler_params=pltpu.CompilerParams(
            dimension_semantics=("parallel", "parallel", "parallel"),
            vmem_limit_bytes=int(vmem_limit),
        ),
    )(x, x, x, wpw, wdw, bias)   # x passed thrice: core strip + the two halo-row views

    if Cp != Cout:
        out = out[..., :Cout]
    return out


def bsconvu_pallas(x_nchw, w_pw, w_dw, b_dw, *, tile_h=None, tile_cout=None):
    """PyTorch-parity NCHW wrapper. Prefer bsconvu_pallas_nhwc in an NHWC model:
    these two transposes are each a full HBM round-trip of the tensor."""
    x = jnp.transpose(x_nchw, (0, 2, 3, 1))                 # NCHW -> NHWC
    out = bsconvu_pallas_nhwc(x, w_pw, w_dw, b_dw, tile_h=tile_h, tile_cout=tile_cout)
    return jnp.transpose(out, (0, 3, 1, 2))                 # NHWC -> NCHW


def bsconvu_reference(x_nchw, w_pw, w_dw, b_dw):
    """Plain-JAX reference matching torch semantics (NCHW)."""
    Cout = w_pw.shape[0]
    mid = jax.lax.conv_general_dilated(
        x_nchw, w_pw, window_strides=(1, 1), padding="VALID",
        dimension_numbers=("NCHW", "OIHW", "NCHW"),
    )
    out = jax.lax.conv_general_dilated(
        mid, w_dw, window_strides=(1, 1), padding=((1, 1), (1, 1)),
        dimension_numbers=("NCHW", "OIHW", "NCHW"),
        feature_group_count=Cout,
    )
    return out + b_dw.reshape(1, Cout, 1, 1)


if __name__ == "__main__":
    key = jax.random.PRNGKey(0)

    # --- Test 1: module-like small shapes; tile_h=8 -> 2 H-tiles per image (exercises the
    #             cross-tile halos) and Cout=8 -> lane-dense padding path (Cout padded to 128).
    N, Cin, Cout, H, W = 2, 4, 8, 16, 16
    k1, k2, k3, k4 = jax.random.split(key, 4)
    x = jax.random.normal(k1, (N, Cin, H, W), dtype=jnp.float32)
    w_pw = jax.random.normal(k2, (Cout, Cin, 1, 1), dtype=jnp.float32) * 0.1
    w_dw = jax.random.normal(k3, (Cout, 1, 3, 3), dtype=jnp.float32) * 0.1
    b_dw = jax.random.normal(k4, (Cout,), dtype=jnp.float32) * 0.1

    out = jax.block_until_ready(bsconvu_pallas(x, w_pw, w_dw, b_dw, tile_h=8))
    ref = jax.block_until_ready(bsconvu_reference(x, w_pw, w_dw, b_dw))
    assert out.shape == (N, Cout, H, W), out.shape
    np.testing.assert_allclose(np.asarray(out), np.asarray(ref), rtol=2e-5, atol=2e-5)

    # --- Test 2: wide-Cout path with auto tile selection (256-wide tiles on v6e/v7x,
    #             128 on v5e), auto TH, and the >=2-grid-step split for v7x.
    N2, Cin2, Cout2, H2, W2 = 1, 8, 256, 16, 16
    k5, k6, k7, k8 = jax.random.split(jax.random.PRNGKey(1), 4)
    x2 = jax.random.normal(k5, (N2, Cin2, H2, W2), dtype=jnp.float32)
    w_pw2 = jax.random.normal(k6, (Cout2, Cin2, 1, 1), dtype=jnp.float32) * 0.1
    w_dw2 = jax.random.normal(k7, (Cout2, 1, 3, 3), dtype=jnp.float32) * 0.1
    b_dw2 = jax.random.normal(k8, (Cout2,), dtype=jnp.float32) * 0.1

    out2 = jax.block_until_ready(bsconvu_pallas(x2, w_pw2, w_dw2, b_dw2))
    ref2 = jax.block_until_ready(bsconvu_reference(x2, w_pw2, w_dw2, b_dw2))
    np.testing.assert_allclose(np.asarray(out2), np.asarray(ref2), rtol=2e-5, atol=2e-5)

    print("KERNEL_OK")
</pallas_src>

<mosaic_0001>
module attributes {stable_mosaic.version = 11 : i64} {
  func.func @_bsconvu_kernel(%arg0: i32, %arg1: i32, %arg2: i32, %arg3: memref<1x1x16x4xf32, #tpu.memory_space<vmem>>, %arg4: memref<1x8x16x4xf32, #tpu.memory_space<vmem>>, %arg5: memref<1x1x16x4xf32, #tpu.memory_space<vmem>>, %arg6: memref<4x128xf32, #tpu.memory_space<vmem>>, %arg7: memref<9x128xf32, #tpu.memory_space<vmem>>, %arg8: memref<1x128xf32, #tpu.memory_space<vmem>>, %arg9: memref<1x8x16x128xf32, #tpu.memory_space<vmem>>, %arg10: memref<10x16x128xf32, #tpu.memory_space<vmem>>) attributes {dimension_semantics = [#tpu.dimension_semantics<parallel>, #tpu.dimension_semantics<parallel>, #tpu.dimension_semantics<parallel>], iteration_bounds = array<i64: 2, 2, 1>, scalar_prefetch = 0 : i64, scratch_operands = 1 : i64, tpu.core_type = #tpu.core_type<tc>, window_params = [{transform_indices = @transform_0, window_bounds = array<i64: 1, 1, 16, 4>}, {transform_indices = @transform_1, window_bounds = array<i64: 1, 8, 16, 4>}, {transform_indices = @transform_2, window_bounds = array<i64: 1, 1, 16, 4>}, {transform_indices = @transform_3, window_bounds = array<i64: 4, 128>}, {transform_indices = @transform_4, window_bounds = array<i64: 9, 128>}, {transform_indices = @transform_5, window_bounds = array<i64: 1, 128>}, {transform_indices = @transform_6, window_bounds = array<i64: 1, 8, 16, 128>}]} {
    %c0_i32 = arith.constant 0 : i32
    %0 = arith.cmpi sgt, %arg1, %c0_i32 : i32
    %1 = arith.extui %0 : i1 to i32
    %2 = arith.sitofp %1 : i32 to f32
    %c1_i32 = arith.constant 1 : i32
    %3 = arith.cmpi slt, %arg1, %c1_i32 : i32
    %4 = arith.extui %3 : i1 to i32
    %5 = arith.sitofp %4 : i32 to f32
    %c0 = arith.constant 0 : index
    %c0_0 = arith.constant 0 : index
    %6 = vector.load %arg6[%c0, %c0_0] : memref<4x128xf32, #tpu.memory_space<vmem>>, vector<4x128xf32>
    %c0_1 = arith.constant 0 : index
    %c0_2 = arith.constant 0 : index
    %c0_3 = arith.constant 0 : index
    %c0_4 = arith.constant 0 : index
    %7 = vector.load %arg4[%c0_1, %c0_2, %c0_3, %c0_4] : memref<1x8x16x4xf32, #tpu.memory_space<vmem>>, vector<1x8x16x4xf32>
    %8 = vector.shape_cast %7 : vector<1x8x16x4xf32> to vector<8x16x4xf32>
    %9 = vector.shape_cast %8 : vector<8x16x4xf32> to vector<128x4xf32>
    %cst = arith.constant dense<0.000000e+00> : vector<128x128xf32>
    %10 = tpu.matmul %9, %6, %cst {dimension_numbers = #tpu.dot_dimension_numbers<[1], [0], [0], [1], [0, 0, 1, 1], [], []>} : vector<128x4xf32>, vector<4x128xf32>, vector<128x128xf32> -> vector<128x128xf32>
    %11 = vector.shape_cast %10 : vector<128x128xf32> to vector<8x16x128xf32>
    %c1 = arith.constant 1 : index
    %c0_5 = arith.constant 0 : index
    %c0_6 = arith.constant 0 : index
    %12 = vector.load %arg10[%c1, %c0_5, %c0_6] : memref<10x16x128xf32, #tpu.memory_space<vmem>>, vector<8x16x128xf32>
    tpu.vector_store %arg10[%c1, %c0_5, %c0_6], %11 {strides = array<i32>} : memref<10x16x128xf32, #tpu.memory_space<vmem>>, vector<8x16x128xf32>,
    %c0_7 = arith.constant 0 : index
    %c0_8 = arith.constant 0 : index
    %c0_9 = arith.constant 0 : index
    %c0_10 = arith.constant 0 : index
    %13 = vector.load %arg3[%c0_7, %c0_8, %c0_9, %c0_10] : memref<1x1x16x4xf32, #tpu.memory_space<vmem>>, vector<1x1x16x4xf32>
    %14 = vector.shape_cast %13 : vector<1x1x16x4xf32> to vector<1x16x4xf32>
    %15 = vector.broadcast %2 : f32 to vector<1x16x4xf32>
    %16 = arith.mulf %14, %15 : vector<1x16x4xf32>
    %17 = vector.shape_cast %16 : vector<1x16x4xf32> to vector<16x4xf32>
    %cst_11 = arith.constant dense<0.000000e+00> : vector<16x128xf32>
    %18 = tpu.matmul %17, %6, %cst_11 {dimension_numbers = #tpu.dot_dimension_numbers<[1], [0], [0], [1], [0, 0, 1, 1], [], []>} : vector<16x4xf32>, vector<4x128xf32>, vector<16x128xf32> -> vector<16x128xf32>
    %c0_12 = arith.constant 0 : index
    %c0_13 = arith.constant 0 : index
    %c0_14 = arith.constant 0 : index
    %19 = vector.load %arg10[%c0_12, %c0_13, %c0_14] : memref<10x16x128xf32, #tpu.memory_space<vmem>>, vector<1x16x128xf32>
    %20 = vector.shape_cast %19 : vector<1x16x128xf32> to vector<16x128xf32>
    %21 = vector.shape_cast %18 : vector<16x128xf32> to vector<1x16x128xf32>
    tpu.vector_store %arg10[%c0_12, %c0_13, %c0_14], %21 {strides = array<i32>} : memref<10x16x128xf32, #tpu.memory_space<vmem>>, vector<1x16x128xf32>,
    %c0_15 = arith.constant 0 : index
    %c0_16 = arith.constant 0 : index
    %c0_17 = arith.constant 0 : index
    %c0_18 = arith.constant 0 : index
    %22 = vector.load %arg5[%c0_15, %c0_16, %c0_17, %c0_18] : memref<1x1x16x4xf32, #tpu.memory_space<vmem>>, vector<1x1x16x4xf32>
    %23 = vector.shape_cast %22 : vector<1x1x16x4xf32> to vector<1x16x4xf32>
    %24 = vector.broadcast %5 : f32 to vector<1x16x4xf32>
    %25 = arith.mulf %23, %24 : vector<1x16x4xf32>
    %26 = vector.shape_cast %25 : vector<1x16x4xf32> to vector<16x4xf32>
    %cst_19 = arith.constant dense<0.000000e+00> : vector<16x128xf32>
    %27 = tpu.matmul %26, %6, %cst_19 {dimension_numbers = #tpu.dot_dimension_numbers<[1], [0], [0], [1], [0, 0, 1, 1], [], []>} : vector<16x4xf32>, vector<4x128xf32>, vector<16x128xf32> -> vector<16x128xf32>
    %c9 = arith.constant 9 : index
    %c0_20 = arith.constant 0 : index
    %c0_21 = arith.constant 0 : index
    %28 = vector.load %arg10[%c9, %c0_20, %c0_21] : memref<10x16x128xf32, #tpu.memory_space<vmem>>, vector<1x16x128xf32>
    %29 = vector.shape_cast %28 : vector<1x16x128xf32> to vector<16x128xf32>
    %30 = vector.shape_cast %27 : vector<16x128xf32> to vector<1x16x128xf32>
    tpu.vector_store %arg10[%c9, %c0_20, %c0_21], %30 {strides = array<i32>} : memref<10x16x128xf32, #tpu.memory_space<vmem>>, vector<1x16x128xf32>,
    %31 = tpu.iota {dimensions = array<i32: 1>} : vector<1x16x1xi32>
    %c0_i32_22 = arith.constant 0 : i32
    %32 = vector.broadcast %c0_i32_22 : i32 to vector<1x16x1xi32>
    %33 = arith.cmpi sgt, %31, %32 : vector<1x16x1xi32>
    %34 = arith.extui %33 : vector<1x16x1xi1> to vector<1x16x1xi32>
    %35 = arith.sitofp %34 : vector<1x16x1xi32> to vector<1x16x1xf32>
    %c15_i32 = arith.constant 15 : i32
    %36 = vector.broadcast %c15_i32 : i32 to vector<1x16x1xi32>
    %37 = arith.cmpi slt, %31, %36 : vector<1x16x1xi32>
    %38 = arith.extui %37 : vector<1x16x1xi1> to vector<1x16x1xi32>
    %39 = arith.sitofp %38 : vector<1x16x1xi32> to vector<1x16x1xf32>
    %c0_23 = arith.constant 0 : index
    %c0_24 = arith.constant 0 : index
    %40 = vector.load %arg7[%c0_23, %c0_24] : memref<9x128xf32, #tpu.memory_space<vmem>>, vector<9x128xf32>
    %c0_25 = arith.constant 0 : index
    %c0_26 = arith.constant 0 : index
    %41 = vector.load %arg8[%c0_25, %c0_26] : memref<1x128xf32, #tpu.memory_space<vmem>>, vector<1x128xf32>
    %42 = vector.shape_cast %41 : vector<1x128xf32> to vector<1x1x128xf32>
    %c0_27 = arith.constant 0 : index
    %c0_28 = arith.constant 0 : index
    %c0_29 = arith.constant 0 : index
    %43 = vector.load %arg10[%c0_27, %c0_28, %c0_29] : memref<10x16x128xf32, #tpu.memory_space<vmem>>, vector<8x16x128xf32>
    %44 = vector.extract_strided_slice %40 {offsets = [0, 0], sizes = [1, 128], strides = [1, 1]} : vector<9x128xf32> to vector<1x128xf32>
    %45 = vector.shape_cast %44 : vector<1x128xf32> to vector<128xf32>
    %46 = vector.shape_cast %45 : vector<128xf32> to vector<1x1x128xf32>
    %c1_i32_30 = arith.constant 1 : i32
    %47 = tpu.dynamic_rotate %43 by %c1_i32_30 dim 1 : vector<8x16x128xf32>, i32 -> vector<8x16x128xf32>
    %48 = vector.broadcast %46 : vector<1x1x128xf32> to vector<1x16x128xf32>
    %49 = vector.broadcast %35 : vector<1x16x1xf32> to vector<1x16x128xf32>
    %50 = arith.mulf %48, %49 : vector<1x16x128xf32>
    %51 = vector.broadcast %50 : vector<1x16x128xf32> to vector<8x16x128xf32>
    %52 = arith.mulf %47, %51 : vector<8x16x128xf32>
    %53 = vector.broadcast %42 : vector<1x1x128xf32> to vector<8x16x128xf32>
    %54 = arith.addf %53, %52 : vector<8x16x128xf32>
    %55 = vector.extract_strided_slice %40 {offsets = [1, 0], sizes = [1, 128], strides = [1, 1]} : vector<9x128xf32> to vector<1x128xf32>
    %56 = vector.shape_cast %55 : vector<1x128xf32> to vector<128xf32>
    %57 = vector.shape_cast %56 : vector<128xf32> to vector<1x1x128xf32>
    %58 = vector.broadcast %57 : vector<1x1x128xf32> to vector<8x16x128xf32>
    %59 = arith.mulf %43, %58 : vector<8x16x128xf32>
    %60 = arith.addf %54, %59 : vector<8x16x128xf32>
    %61 = vector.extract_strided_slice %40 {offsets = [2, 0], sizes = [1, 128], strides = [1, 1]} : vector<9x128xf32> to vector<1x128xf32>
    %62 = vector.shape_cast %61 : vector<1x128xf32> to vector<128xf32>
    %63 = vector.shape_cast %62 : vector<128xf32> to vector<1x1x128xf32>
    %c15_i32_31 = arith.constant 15 : i32
    %64 = tpu.dynamic_rotate %43 by %c15_i32_31 dim 1 : vector<8x16x128xf32>, i32 -> vector<8x16x128xf32>
    %65 = vector.broadcast %63 : vector<1x1x128xf32> to vector<1x16x128xf32>
    %66 = vector.broadcast %39 : vector<1x16x1xf32> to vector<1x16x128xf32>
    %67 = arith.mulf %65, %66 : vector<1x16x128xf32>
    %68 = vector.broadcast %67 : vector<1x16x128xf32> to vector<8x16x128xf32>
    %69 = arith.mulf %64, %68 : vector<8x16x128xf32>
    %70 = arith.addf %60, %69 : vector<8x16x128xf32>
    %c1_32 = arith.constant 1 : index
    %c0_33 = arith.constant 0 : index
    %c0_34 = arith.constant 0 : index
    %71 = vector.load %arg10[%c1_32, %c0_33, %c0_34] : memref<10x16x128xf32, #tpu.memory_space<vmem>>, vector<8x16x128xf32>
    %72 = vector.extract_strided_slice %40 {offsets = [3, 0], sizes = [1, 128], strides = [1, 1]} : vector<9x128xf32> to vector<1x128xf32>
    %73 = vector.shape_cast %72 : vector<1x128xf32> to vector<128xf32>
    %74 = vector.shape_cast %73 : vector<128xf32> to vector<1x1x128xf32>
    %c1_i32_35 = arith.constant 1 : i32
    %75 = tpu.dynamic_rotate %71 by %c1_i32_35 dim 1 : vector<8x16x128xf32>, i32 -> vector<8x16x128xf32>
    %76 = vector.broadcast %74 : vector<1x1x128xf32> to vector<1x16x128xf32>
    %77 = vector.broadcast %35 : vector<1x16x1xf32> to vector<1x16x128xf32>
    %78 = arith.mulf %76, %77 : vector<1x16x128xf32>
    %79 = vector.broadcast %78 : vector<1x16x128xf32> to vector<8x16x128xf32>
    %80 = arith.mulf %75, %79 : vector<8x16x128xf32>
    %81 = arith.addf %70, %80 : vector<8x16x128xf32>
    %82 = vector.extract_strided_slice %40 {offsets = [4, 0], sizes = [1, 128], strides = [1, 1]} : vector<9x128xf32> to vector<1x128xf32>
    %83 = vector.shape_cast %82 : vector<1x128xf32> to vector<128xf32>
    %84 = vector.shape_cast %83 : vector<128xf32> to vector<1x1x128xf32>
    %85 = vector.broadcast %84 : vector<1x1x128xf32> to vector<8x16x128xf32>
    %86 = arith.mulf %71, %85 : vector<8x16x128xf32>
    %87 = arith.addf %81, %86 : vector<8x16x128xf32>
    %88 = vector.extract_strided_slice %40 {offsets = [5, 0], sizes = [1, 128], strides = [1, 1]} : vector<9x128xf32> to vector<1x128xf32>
    %89 = vector.shape_cast %88 : vector<1x128xf32> to vector<128xf32>
    %90 = vector.shape_cast %89 : vector<128xf32> to vector<1x1x128xf32>
    %c15_i32_36 = arith.constant 15 : i32
    %91 = tpu.dynamic_rotate %71 by %c15_i32_36 dim 1 : vector<8x16x128xf32>, i32 -> vector<8x16x128xf32>
    %92 = vector.broadcast %90 : vector<1x1x128xf32> to vector<1x16x128xf32>
    %93 = vector.broadcast %39 : vector<1x16x1xf32> to vector<1x16x128xf32>
    %94 = arith.mulf %92, %93 : vector<1x16x128xf32>
    %95 = vector.broadcast %94 : vector<1x16x128xf32> to vector<8x16x128xf32>
    %96 = arith.mulf %91, %95 : vector<8x16x128xf32>
    %97 = arith.addf %87, %96 : vector<8x16x128xf32>
    %c2 = arith.constant 2 : index
    %c0_37 = arith.constant 0 : index
    %c0_38 = arith.constant 0 : index
    %98 = vector.load %arg10[%c2, %c0_37, %c0_38] : memref<10x16x128xf32, #tpu.memory_space<vmem>>, vector<8x16x128xf32>
    %99 = vector.extract_strided_slice %40 {offsets = [6, 0], sizes = [1, 128], strides = [1, 1]} : vector<9x128xf32> to vector<1x128xf32>
    %100 = vector.shape_cast %99 : vector<1x128xf32> to vector<128xf32>
    %101 = vector.shape_cast %100 : vector<128xf32> to vector<1x1x128xf32>
    %c1_i32_39 = arith.constant 1 : i32
    %102 = tpu.dynamic_rotate %98 by %c1_i32_39 dim 1 : vector<8x16x128xf32>, i32 -> vector<8x16x128xf32>
    %103 = vector.broadcast %101 : vector<1x1x128xf32> to vector<1x16x128xf32>
    %104 = vector.broadcast %35 : vector<1x16x1xf32> to vector<1x16x128xf32>
    %105 = arith.mulf %103, %104 : vector<1x16x128xf32>
    %106 = vector.broadcast %105 : vector<1x16x128xf32> to vector<8x16x128xf32>
    %107 = arith.mulf %102, %106 : vector<8x16x128xf32>
    %108 = arith.addf %97, %107 : vector<8x16x128xf32>
    %109 = vector.extract_strided_slice %40 {offsets = [7, 0], sizes = [1, 128], strides = [1, 1]} : vector<9x128xf32> to vector<1x128xf32>
    %110 = vector.shape_cast %109 : vector<1x128xf32> to vector<128xf32>
    %111 = vector.shape_cast %110 : vector<128xf32> to vector<1x1x128xf32>
    %112 = vector.broadcast %111 : vector<1x1x128xf32> to vector<8x16x128xf32>
    %113 = arith.mulf %98, %112 : vector<8x16x128xf32>
    %114 = arith.addf %108, %113 : vector<8x16x128xf32>
    %115 = vector.extract_strided_slice %40 {offsets = [8, 0], sizes = [1, 128], strides = [1, 1]} : vector<9x128xf32> to vector<1x128xf32>
    %116 = vector.shape_cast %115 : vector<1x128xf32> to vector<128xf32>
    %117 = vector.shape_cast %116 : vector<128xf32> to vector<1x1x128xf32>
    %c15_i32_40 = arith.constant 15 : i32
    %118 = tpu.dynamic_rotate %98 by %c15_i32_40 dim 1 : vector<8x16x128xf32>, i32 -> vector<8x16x128xf32>
    %119 = vector.broadcast %117 : vector<1x1x128xf32> to vector<1x16x128xf32>
    %120 = vector.broadcast %39 : vector<1x16x1xf32> to vector<1x16x128xf32>
    %121 = arith.mulf %119, %120 : vector<1x16x128xf32>
    %122 = vector.broadcast %121 : vector<1x16x128xf32> to vector<8x16x128xf32>
    %123 = arith.mulf %118, %122 : vector<8x16x128xf32>
    %124 = arith.addf %114, %123 : vector<8x16x128xf32>
    %c0_41 = arith.constant 0 : index
    %c0_42 = arith.constant 0 : index
    %c0_43 = arith.constant 0 : index
    %c0_44 = arith.constant 0 : index
    %125 = vector.load %arg9[%c0_41, %c0_42, %c0_43, %c0_44] : memref<1x8x16x128xf32, #tpu.memory_space<vmem>>, vector<1x8x16x128xf32>
    %126 = vector.shape_cast %125 : vector<1x8x16x128xf32> to vector<8x16x128xf32>
    %127 = vector.shape_cast %124 : vector<8x16x128xf32> to vector<1x8x16x128xf32>
    tpu.vector_store %arg9[%c0_41, %c0_42, %c0_43, %c0_44], %127 {strides = array<i32>} : memref<1x8x16x128xf32, #tpu.memory_space<vmem>>, vector<1x8x16x128xf32>,
    return
  }
  func.func @transform_0(%arg0: i32, %arg1: i32, %arg2: i32) -> (i32, i32, i32, i32) {
    %c8_i32 = arith.constant 8 : i32
    %0 = arith.muli %arg1, %c8_i32 : i32
    %c1_i32 = arith.constant 1 : i32
    %1 = arith.subi %0, %c1_i32 : i32
    %c0_i32 = arith.constant 0 : i32
    %2 = arith.maxsi %1, %c0_i32 : i32
    %c0_i32_0 = arith.constant 0 : i32
    %c0_i32_1 = arith.constant 0 : i32
    %c0_i32_2 = arith.constant 0 : i32
    return %arg0, %2, %c0_i32_0, %c0_i32_1 : i32, i32, i32, i32
  }
  func.func @transform_1(%arg0: i32, %arg1: i32, %arg2: i32) -> (i32, i32, i32, i32) {
    %c0_i32 = arith.constant 0 : i32
    %c0_i32_0 = arith.constant 0 : i32
    %c0_i32_1 = arith.constant 0 : i32
    return %arg0, %arg1, %c0_i32, %c0_i32_0 : i32, i32, i32, i32
  }
  func.func @transform_2(%arg0: i32, %arg1: i32, %arg2: i32) -> (i32, i32, i32, i32) {
    %c1_i32 = arith.constant 1 : i32
    %0 = arith.addi %arg1, %c1_i32 : i32
    %c8_i32 = arith.constant 8 : i32
    %1 = arith.muli %0, %c8_i32 : i32
    %c15_i32 = arith.constant 15 : i32
    %2 = arith.minsi %1, %c15_i32 : i32
    %c0_i32 = arith.constant 0 : i32
    %c0_i32_0 = arith.constant 0 : i32
    %c0_i32_1 = arith.constant 0 : i32
    return %arg0, %2, %c0_i32, %c0_i32_0 : i32, i32, i32, i32
  }
  func.func @transform_3(%arg0: i32, %arg1: i32, %arg2: i32) -> (i32, i32) {
    %c0_i32 = arith.constant 0 : i32
    %c0_i32_0 = arith.constant 0 : i32
    return %c0_i32, %arg2 : i32, i32
  }
  func.func @transform_4(%arg0: i32, %arg1: i32, %arg2: i32) -> (i32, i32) {
    %c0_i32 = arith.constant 0 : i32
    %c0_i32_0 = arith.constant 0 : i32
    return %c0_i32, %arg2 : i32, i32
  }
  func.func @transform_5(%arg0: i32, %arg1: i32, %arg2: i32) -> (i32, i32) {
    %c0_i32 = arith.constant 0 : i32
    %c0_i32_0 = arith.constant 0 : i32
    return %c0_i32, %arg2 : i32, i32
  }
  func.func @transform_6(%arg0: i32, %arg1: i32, %arg2: i32) -> (i32, i32, i32, i32) {
    %c0_i32 = arith.constant 0 : i32
    %c0_i32_0 = arith.constant 0 : i32
    return %arg0, %arg1, %c0_i32, %arg2 : i32, i32, i32, i32
  }
}

</mosaic_0001>

<bundles_post_ra>
// kernel: tpu_custom_call.1
= control target key start
LH: loop header
LB: loop body
LE: loop exit
PB: predicated region body
PF: predicated region fallthrough
CT: control target
= control target key end

     0   :  { %s2573_s0 = inlined_call_operand.vmem [shape: f32[2,16,16,4], index: 0, kind: input, shape index: {}]   ;;  %s2574_s1 = inlined_call_operand.vmem [shape: f32[2,16,16,4], index: 1, kind: input, shape index: {}]   ;;  %s2575_s2 = inlined_call_operand.vmem [shape: f32[2,16,16,4], index: 2, kind: input, shape index: {}]   ;;  %s2576_s3 = inlined_call_operand.vmem [shape: f32[4,128], index: 3, kind: input, shape index: {}]   ;;  %s2577_s4 = inlined_call_operand.vmem [shape: f32[9,128], index: 4, kind: input, shape index: {}]   ;;  %s2578_s5 = inlined_call_operand.vmem [shape: f32[1,128], index: 5, kind: input, shape index: {}]   ;;  %s2579_s6 = inlined_call_operand.hbm [shape: f32[2,16,16,128], index: 6, kind: output, shape index: {}]  }
   0x1   :  { %2585 = sst [smem:[#allocation45_spill]] %s2574_s1 }
   0x2   :  { %2586 = sst [smem:[#allocation46_spill]] %s2576_s3 }
   0x3   :  { %11 = vsyncpa [#allocation4], 0 }
   0x4   :  { %13 = vsyncpa [#allocation4 + $0x1], 0  ;;  %s1768_s21 = smov 0   ;;  %s1770_s22 = smov 0  }
   0x5   :  { %s1772_s23 = smov 0   ;;  %s1774_s24 = smov 0  }
   0x6   :  { %s1776_s25 = smov 0   ;;  %s1778_s26 = smov 0  }
   0x7   :  { %s1780_s27 = smov 0   ;;  %s1782_s28 = smov 0  }
   0x8 LB: > { %2587 = sst [smem:[#allocation6_spill]] %s1720_s26  ;;  %s1478_s29 = sadd.s32 4294967295, %s1728_s28   ;;  %s1728_s28 = sphi %s1782_s28, %s19_s28   ;;  %s1724_s27 = sphi %s1780_s27, %s2695_s27   ;;  %s1720_s26 = sphi %s1778_s26, %s2694_s26   ;;  %s1716_s25 = sphi %s1776_s25, %s2693_s25   ;;  %s1712_s24 = sphi %s1774_s24, %s2692_s24   ;;  %s1708_s23 = sphi %s1772_s23, %s2698_s23   ;;  %s1704_s22 = sphi %s1770_s22, %s2697_s22   ;;  %s1700_s21 = sphi %s1768_s21, %s2696_s21  }
   0x9   : > { %2588 = sst [smem:[#allocation7_spill]] %s1724_s27  ;;  %s1479_s30 = sadd.s32 4294967294, %s1728_s28  }
   0xa   : > { %s34_s7 = sadd.s32 1, %s1720_s26  ;;  %s38_s8 = sadd.s32 1, %s1724_s27 }
   0xb   : > { %p36_p0 = scmp.ge.s32.totalorder %s34_s7, 2  ;;  %p237_p1 = scmp.ne.s32.totalorder %s1708_s23, %s1704_s22 }
   0xc   : > { %p238_p2 = scmp.eq.s32.totalorder %s1478_s29, 3  ;;  %p243_p5 = scmp.ne.s32.totalorder %s1704_s22, %s1700_s21 }
   0xd   : > { %s2700_s7 = smov (%p36_p0, %s34_s7), 0  ;;  %s2702_s8 = smov (!%p36_p0, %s38_s8), %s1724_s27 }
   0xe   : > { %2589 = sst [smem:[#allocation8_spill]] %s2700_s7  ;;  %s221_s9 = ssub.s32 %s1720_s26, %s2700_s7 }
   0xf   : > { %p1819_p3 = por %p238_p2, %p237_p1  ;;  %p40_p4 = scmp.ge.s32.totalorder %s2702_s8, 2 }
  0x10   : > { %p244_p6 = scmp.eq.s32.totalorder %s1479_s30, 3  ;;  %p1491_p7 = scmp.ge.s32.totalorder %s1728_s28, 1 }
  0x11   : > { %s2704_s8 = smov (%p40_p4, %s2702_s8), 0  ;;  %p336_p9 = scmp.lt.s32.totalorder %s1728_s28, 5 }
  0x12   : > { %2591 = sst [smem:[#allocation9_spill]] %s2704_s8  ;;  %p1828_p8 = por %p244_p6, %p243_p5 }
  0x13   : > { %s220_s12 = ssub.s32 %s1724_s27, %s2704_s8  ;;  %s227_s13 = sadd.s32 1, %s1708_s23 }
  0x14   : > { %s222_s14 = sor.u32 %s221_s9, %s220_s12  ;;  %p337_p10 = pnand %p1491_p7, %p336_p9 }
  0x15   : > { %p225_p11 = scmp.eq.s32.totalorder %s222_s14, 0 }
  0x16   : > { %340 = sbr.rel (%p337_p10) target bundleno = 278 (0x116), region = 44 }
  0x17   : > { %s1837_s15 = scalar_select %p225_p11, %s1708_s23, %s227_s13  }
  0x19   : > { %2593 = sst [smem:[#allocation10_spill]] %s1837_s15 }
  0x1b   : > { %s2594_s3 = sld [smem:[#allocation46_spill]]  ;;  %vm537_vm0 = vcmask 1043456   ;;  %s1843_s18 = sshll.u32 %s1712_s24, 3  ;;  %vm488_vm1 = vcmask 31744   ;;  %v696_v27 = vlaneseq  ;;  %v711_v31 = vld [vmem:[%s2577_s4] sm:$0xff]  ;;  %v1730_v36 = vmov 0.0  }
  0x1c   : > { %p412_p12 = scmp.lt.s32.totalorder %s1716_s25, 1  ;;  %p428_p13 = scmp.lt.s32.totalorder %s1843_s18, 15  ;;  %v1925_v33 = vperm.slane %v711_v31, 0  ;;  %v1927_v34 = vperm.slane %v711_v31, 2  ;;  %v1929_v35 = vperm.slane %v711_v31, 3  ;;  %v1931_v39 = vperm.slane %v711_v31, 5 }
  0x1d   : > { %s1494_s19 = sadd.s32 4294967295, %s1843_s18  ;;  %s2595_s1 = sld [smem:[#allocation45_spill]]  ;;  %v1916_v28 = vshrl.u32 %v696_v27, 7  ;;  %v1933_v40 = vperm.slane %v711_v31, 6  ;;  %v1938_v41 = vld [vmem:[%s2577_s4 + $0x8] ss:$0 sm:$0xff] }
  0x1e   : > { %s413_s20 = scalar_select %p412_p12, %s1716_s25, 1  ;;  %v1940_v42 = vperm.slane %v711_v31, 1  ;;  %v1942_v43 = vperm.slane %v711_v31, 4  ;;  %v1944_v44 = vperm.slane %v711_v31, 7 }
  0x1f   : > { %s429_s29 = scalar_select %p428_p13, %s1843_s18, 15  ;;  %v698_v29 = vadd.s32 8, %v1916_v28  ;;  %vm699_vm2 = vcmp.gt.s32.totalorder %v1916_v28, 0  ;;  %vm746_vm4 = vcmp.lt.s32.totalorder %v1916_v28, 1  ;;  %vm850_vm5 = vcmp.lt.s32.totalorder %v1916_v28, 7 }
  0x20   : > { %s1850_s30 = sshll.u32 %s413_s20, 5  ;;  %p410_p0 = scmp.gt.s32.totalorder %s1494_s19, 0  ;;  %v1537_v37 = vsel %vm699_vm2, 1.0, %v1730_v36 }
  0x21   : > { %v471_v0 = vld [vmem:[%s2594_s3] sm:$0xf]  ;;  %s1504_s9 = sshll.u32 %s429_s29, 1  ;;  %p1495_p1 = scmp.lt.s32.totalorder %s1494_s19, 15  ;;  %vm706_vm3 = vcmp.lt.s32.totalorder %v698_v29, 15  ;;  %v1948_v45 = vmul.f32 %v1537_v37, %v1925_v33  ;;  %v1955_v47 = vmul.f32 %v1537_v37, %v1929_v35  ;;  %v1961_v50 = vmul.f32 %v1537_v37, %v1933_v40 }
  0x22   : > { %1514 = vmatpush.msk.msra.mxu0 %vm537_vm0, %v471_v0  ;;  %1555 = vmatpush.msk.msra.mxu1 %vm537_vm0, %v471_v0  ;;  %s432_s12 = sadd.s32 %s1504_s9, %s1850_s30  ;;  %s2706_s19 = smov (!%p410_p0, %s1494_s19), 0  ;;  %v1538_v38 = vsel %vm706_vm3, 1.0, %v1730_v36 }
  0x23   : > { %1556 = vmatpush.msk.msra.mxu2 %vm537_vm0, %v471_v0  ;;  %1557 = vmatpush.msk.msra.mxu3 %vm537_vm0, %v471_v0  ;;  %s1506_s13 = sshll.u32 %s432_s12, 3  ;;  %p465_p2 = scmp.gt.s32.totalorder %s1712_s24, 0  ;;  %v1952_v46 = vmul.f32 %v1538_v38, %v1927_v34  ;;  %v1958_v49 = vmul.f32 %v1538_v38, %v1931_v39  ;;  %v1964_v51 = vmul.f32 %v1938_v41, %v1538_v38 }
  0x24   : > { %1531 = vmatpush.msk.msrb.mxu1 %vm537_vm0, %v471_v0  ;;  %s1856_s17 = scalar_lea.vmem %s2595_s1, %s1506_s13  ;;  %s1553_s20 = sadd.s32 8, %s1843_s18 }
  0x25   : > { %1534 = vmatpush.msk.msrb.mxu2 %vm537_vm0, %v471_v0  ;;  %v472_v1 = vld [vmem:[%s1856_s17] sm:$0xff]  ;;  %v477_v2 = vld [vmem:[%s1856_s17 + $0x28] sm:$0xff]  ;;  %v483_v4 = vld [vmem:[%s1856_s17 + $0x58] sm:$0xff]  ;;  %s2708_s19 = smov (!%p1495_p1, %s2706_s19), 15  ;;  %p1868_p4 = scmp.lt.s32.totalorder %s1553_s20, 15 }
  0x26   : > { %v480_v3 = vld [vmem:[%s1856_s17 + $0x40] sm:$0xff]  ;;  %1515 = vmatmul.msk.f32.vlgmr.msra.gmra.mxu0 %vm488_vm1, %v472_v1  ;;  %1520 = vmatmul.msk.f32.vlgmr.msra.gmra.mxu1 %vm488_vm1, %v477_v2  ;;  %s1872_s9 = scalar_select %p465_p2, 1, 0  ;;  %v473_v5 = vld [vmem:[%s1856_s17 + $0x8] sm:$0xff]  ;;  %v478_v6 = vld [vmem:[%s1856_s17 + $0x30] sm:$0xff] }
  0x27   : > { %1523 = vmatmul.msk.f32.vlgmr.msra.gmra.mxu2 %vm488_vm1, %v480_v3  ;;  %1526 = vmatmul.msk.f32.vlgmr.msra.gmra.mxu3 %vm488_vm1, %v483_v4  ;;  %s1500_s12 = sshll.u32 %s2708_s19, 1  ;;  %v481_v7 = vld [vmem:[%s1856_s17 + $0x48] sm:$0xff]  ;;  %v484_v8 = vld [vmem:[%s1856_s17 + $0x60] sm:$0xff]  ;;  %p468_p5 = scmp.lt.s32.totalorder %s1712_s24, 1  ;;  %v474_v9 = vld [vmem:[%s1856_s17 + $0x10] sm:$0xff] }
  0x28   : > { %s2710_s20 = smov (!%p1868_p4, %s1553_s20), 15  ;;  %s418_s18 = sadd.s32 %s1850_s30, %s1500_s12  ;;  %v479_v10 = vld [vmem:[%s1856_s17 + $0x38] sm:$0xff]  ;;  %v482_v11 = vld [vmem:[%s1856_s17 + $0x50] sm:$0xff]  ;;  %v485_v12 = vld [vmem:[%s1856_s17 + $0x68] sm:$0xff] }
  0x29   : > { %s2712_s20 = smov (!%p1868_p4, %s2710_s20), 15  ;;  %s1502_s13 = sshll.u32 %s418_s18, 3  ;;  %v475_v18 = vld [vmem:[%s1856_s17 + $0x18] sm:$0xff]  ;;  %v486_v20 = vld [vmem:[%s1856_s17 + $0x70] sm:$0xff]  ;;  %v476_v24 = vld [vmem:[%s1856_s17 + $0x20] sm:$0xff] }
  0x2a   : > { %s469_s19 = scalar_select %p468_p5, 1, 0  ;;  %v487_v26 = vld [vmem:[%s1856_s17 + $0x78] sm:$0xff] }
  0x2b   : > { %s1511_s14 = sshll.u32 %s2712_s20, 1  ;;  %s467_s1 = scvt.s32.f32 %s1872_s9 }
  0x2c   : > { %s446_s16 = sadd.s32 %s1511_s14, %s1850_s30  ;;  %s420_s7 = scalar_lea.vmem %s2573_s0, %s1502_s13 }
  0x2d   : > { %s1513_s3 = sshll.u32 %s446_s16, 3  ;;  %s470_s27 = scvt.s32.f32 %s469_s19  ;;  %v623_v13 = vld [vmem:[%s420_s7] sm:$0xff]  ;;  %v625_v14 = vstv %s467_s1  ;;  %v624_v21 = vld [vmem:[%s420_s7 + $0x8] sm:$0xff] }
  0x2e   : > { %1516 = vmatmul.msk.f32.gmra.mxu0 %vm488_vm1, %v473_v5  ;;  %1521 = vmatmul.msk.f32.gmra.mxu1 %vm488_vm1, %v478_v6  ;;  %s448_s15 = scalar_lea.vmem %s2575_s2, %s1513_s3  ;;  %v626_v17 = vmul.f32 %v625_v14, %v623_v13  ;;  %v627_v23 = vmul.f32 %v625_v14, %v624_v21  ;;  %s1554_s20 = sshll.u32 %s1712_s24, 4 }
  0x2f   : > { %1524 = vmatmul.msk.f32.gmra.mxu2 %vm488_vm1, %v481_v7  ;;  %1527 = vmatmul.msk.f32.gmra.mxu3 %vm488_vm1, %v484_v8  ;;  %v659_v15 = vld [vmem:[%s448_s15] sm:$0xff]  ;;  %v661_v16 = vstv %s470_s27  ;;  %v660_v22 = vld [vmem:[%s448_s15 + $0x8] sm:$0xff]  ;;  %s405_s15 = sand.u32 1, %s1704_s22   ;;  %s1542_s9 = sshll.u32 %s1716_s25, 5 }
  0x30   : > { %v662_v19 = vmul.f32 %v661_v16, %v659_v15  ;;  %v663_v25 = vmul.f32 %v661_v16, %v660_v22  ;;  %s1492_s30 = sshll.u32 %s405_s15, 7  ;;  %s1299_s24 = sadd.s32 %s1554_s20, %s1542_s9 }
  0x31   : > { %s2271_s17 = scalar_lea.vmem [#allocation3], %s1492_s30  ;;  %s1543_s25 = sshll.u32 %s1299_s24, 3 }
  0x32   : > { %s1301_s13 = scalar_lea.hbm %s2579_s6, %s1543_s25  ;;  %s1302_s14 = sshll.u32 %s2271_s17, 4  ;;  %s1303_s14 = int_to_ptr.vmem [resolvable:$true] %s1302_s14 }
  0x33   : > { %s1304_s16 = sshll.u32 %s1301_s13, 4  ;;  %s1286_s12 = scalar_lea.sflag [#allocation4], %s405_s15  ;;  %s1305_s16 = int_to_ptr.hbm [resolvable:$true] %s1304_s16 }
  0x34   : > { %s1648_s29 = sshra.s32 %s1305_s16, 4  ;;  %s1654_s27 = scalar_lea.hbm %s2579_s6, 512  ;;  %s1649_s29 = int_to_ptr.hbm [resolvable:$true] %s1648_s29 }
  0x35   : > { %s1650_s1 = scalar_lea.hbm %s1649_s29, 128  ;;  %p1655_p10 = scmp.lt.s32.totalorder %s1649_s29, %s2579_s6 }
  0x36   : > { %1517 = vmatmul.msk.f32.gmra.mxu0 %vm488_vm1, %v474_v9  ;;  %1522 = vmatmul.msk.f32.gmra.mxu1 %vm488_vm1, %v479_v10  ;;  %v2012_v10 = vld [vmem:[%s2578_s5] ss:$0 sm:$0xff]  ;;  %p1651_p6 = scmp.ne.s32.totalorder %s1649_s29, %s1650_s1  ;;  %p1656_p11 = scmp.lt.s32.totalorder %s1654_s27, %s1650_s1 }
  0x37   : > { %1525 = vmatmul.msk.f32.gmra.mxu2 %vm488_vm1, %v482_v11  ;;  %1528 = vmatmul.msk.f32.gmra.mxu3 %vm488_vm1, %v485_v12 }
  0x38   : > { %p1652_p7 = pnand %p1651_p6, %p1819_p3  ;;  %p1657_p12 = por %p1656_p11, %p1655_p10 }
  0x3a   : > { %p1653_p9 = pneg %p1652_p7 }
  0x3c   : > { %p1658_p13 = pnand %p1657_p12, %p1653_p9 }
  0x3e   : > { %1518 = vmatmul.msk.f32.gmra.mxu0 %vm488_vm1, %v475_v18  ;;  %1532 = vmatmul.msk.f32.vlgmr.msrb.gmra.mxu1 %vm488_vm1, %v626_v17 }
  0x3f   : > { %1529 = vmatmul.msk.f32.gmra.mxu3 %vm488_vm1, %v486_v20  ;;  %1535 = vmatmul.msk.f32.vlgmr.msrb.gmra.mxu2 %vm488_vm1, %v662_v19 }
  0x46   : > { %1519 = vmatmul.msk.f32.gmra.mxu0 %vm488_vm1, %v476_v24  ;;  %1533 = vmatmul.msk.f32.gmra.mxu1 %vm488_vm1, %v627_v23 }
  0x47   : > { %1530 = vmatmul.msk.f32.gmra.mxu3 %vm488_vm1, %v487_v26  ;;  %1536 = vmatmul.msk.f32.gmra.mxu2 %vm488_vm1, %v663_v25 }
  0xa3   : > { %v558_v30 = vpop.f32.mrf.mxu0  ;;  %v1923_v32 = vpop.f32.mrf.mxu1 }
  0xa4   : > { %v731_v48 = vrot.slane %v558_v30, 7  ;;  %v804_v52 = vmul.f32 %v1940_v42, %v558_v30  ;;  %v835_v53 = vrot.slane %v558_v30, 1  ;;  %v1968_v54 = vmul.f32 %v1942_v43, %v558_v30 }
  0xa5   : > { %v1975_v58 = vmul.f32 %v1940_v42, %v1923_v32  ;;  %v1980_v60 = vmul.f32 %v1942_v43, %v1923_v32  ;;  %v1984_v61 = vmul.f32 %v1944_v44, %v1923_v32 }
  0xa6   : > { %2597 = vst [vmem:[#allocation11_spill] sm:$0xff] %v1968_v54 }
  0xa7   : > { %2598 = vst [vmem:[#allocation12_spill] sm:$0xff] %v1975_v58 }
  0xa8   : > { %2599 = vst [vmem:[#allocation13_spill] sm:$0xff] %v1980_v60 }
  0xa9   : > { %2600 = vst [vmem:[#allocation14_spill] sm:$0xff] %v1984_v61 }
  0xaa   : > { %v582_v56 = vpop.f32.mrf.mxu2  ;;  %v1971_v57 = vpop.f32.mrf.mxu3 }
  0xab   : > { %v561_v62 = vpop.f32.mrf.mxu0  ;;  %v735_v63 = vrot.slane %v582_v56, 7  ;;  %v1987_v0 = vmul.f32 %v1940_v42, %v582_v56  ;;  %v839_v1 = vrot.slane %v582_v56, 1  ;;  %v1990_v2 = vmul.f32 %v1942_v43, %v582_v56  ;;  %v2014_v12 = vpop.f32.mrf.mxu1 }
  0xac   : > { %v1993_v3 = vmul.f32 %v1944_v44, %v582_v56  ;;  %v1998_v5 = vmul.f32 %v1940_v42, %v1971_v57  ;;  %v739_v6 = vrot.slane %v561_v62, 7  ;;  %v2003_v8 = vmul.f32 %v1942_v43, %v1971_v57 }
  0xad   : > { %v2007_v9 = vmul.f32 %v1944_v44, %v1971_v57  ;;  %v843_v11 = vrot.slane %v561_v62, 1  ;;  %v805_v15 = vmul.f32 %v1940_v42, %v561_v62  ;;  %v2024_v16 = vmul.f32 %v1942_v43, %v561_v62 }
  0xae   : > { %2601 = vst [vmem:[#allocation15_spill] sm:$0xff] %v1993_v3  ;;  %v2018_v13 = vsel %vm746_vm4, %v731_v48, %v739_v6  ;;  %v756_v14 = vsel %vm746_vm4, %v739_v6, %v731_v48  ;;  %v734_v21 = vrot.slane %v2014_v12, 7  ;;  %v2036_v22 = vmul.f32 %v1940_v42, %v2014_v12 }
  0xaf   : > { %2602 = vst [vmem:[#allocation16_spill] sm:$0xff] %v2018_v13  ;;  %v768_v17 = vmul.f32 %v1948_v45, %v756_v14  ;;  %v769_v18 = vmul.f32 %v1925_v33, %v2018_v13  ;;  %v852_v19 = vsel %vm850_vm5, %v835_v53, %v843_v11  ;;  %v860_v20 = vsel %vm850_vm5, %v843_v11, %v835_v53 }
  0xb0   : > { %2603 = vst [vmem:[#allocation17_spill] sm:$0xff] %v2024_v16  ;;  %v2041_v24 = vmul.f32 %v1942_v43, %v2014_v12  ;;  %v872_v27 = vmul.f32 %v1927_v34, %v852_v19  ;;  %v873_v29 = vmul.f32 %v1952_v46, %v860_v20  ;;  %v2048_v31 = vmul.f32 %v1955_v47, %v756_v14 }
  0xb1   : > { %v787_v25 = vadd.f32 %v2012_v10, %v768_v17  ;;  %v788_v26 = vadd.f32 %v2012_v10, %v769_v18  ;;  %v2051_v36 = vmul.f32 %v1931_v39, %v852_v19  ;;  %v2054_v56 = vmul.f32 %v1958_v49, %v860_v20 }
  0xb2   : > { %2604 = vst [vmem:[#allocation18_spill] sm:$0xff] %v2041_v24  ;;  %v585_v30 = vpop.f32.mrf.mxu2  ;;  %v2058_v62 = vmul.f32 %v1944_v44, %v2014_v12  ;;  %v2060_v6 = vpop.f32.mrf.mxu3 }
  0xb3   : > { %2605 = vst [vmem:[#allocation19_spill] sm:$0xff] %v2048_v31  ;;  %v743_v37 = vrot.slane %v585_v30, 7  ;;  %v847_v38 = vrot.slane %v585_v30, 1  ;;  %v820_v48 = vadd.f32 %v804_v52, %v787_v25  ;;  %v821_v53 = vadd.f32 %v805_v15, %v788_v26 }
  0xb4   : > { %2606 = vst [vmem:[#allocation20_spill] sm:$0xff] %v2051_v36  ;;  %v813_v19 = vmul.f32 %v1940_v42, %v585_v30  ;;  %v2074_v20 = vmul.f32 %v1942_v43, %v585_v30 }
  0xb5   : > { %2607 = vst [vmem:[#allocation21_spill] sm:$0xff] %v2054_v56  ;;  %v752_v11 = vsel %vm746_vm4, %v735_v63, %v743_v37  ;;  %v760_v14 = vsel %vm746_vm4, %v743_v37, %v735_v63  ;;  %v856_v17 = vsel %vm850_vm5, %v839_v1, %v847_v38  ;;  %v864_v52 = vsel %vm850_vm5, %v847_v38, %v839_v1 }
  0xb6   : > { %2608 = vst [vmem:[#allocation22_spill] sm:$0xff] %v2058_v62  ;;  %v776_v15 = vmul.f32 %v1948_v45, %v760_v14  ;;  %v777_v18 = vmul.f32 %v1925_v33, %v752_v11  ;;  %v2076_v25 = vadd.f32 %v872_v27, %v820_v48  ;;  %v2078_v26 = vadd.f32 %v873_v29, %v821_v53  ;;  %v2098_v48 = vpop.f32.mrf.mxu0  ;;  %v579_v53 = vpop.f32.mrf.mxu1 }
  0xb7   : > { %v2081_v63 = vmul.f32 %v1944_v44, %v585_v30  ;;  %v880_v38 = vmul.f32 %v1927_v34, %v856_v17  ;;  %v881_v59 = vmul.f32 %v1952_v46, %v864_v52  ;;  %v2088_v55 = vmul.f32 %v1955_v47, %v760_v14 }
  0xb8   : > { %v796_v1 = vadd.f32 %v2012_v10, %v777_v18  ;;  %v795_v7 = vadd.f32 %v2012_v10, %v776_v15  ;;  %v962_v27 = vmul.f32 %v1929_v35, %v752_v11  ;;  %v2093_v29 = vmul.f32 %v1931_v39, %v856_v17 }
  0xb9   : > { %2609 = vst [vmem:[#allocation23_spill] sm:$0xff] %v2081_v63  ;;  %v2096_v30 = vmul.f32 %v1958_v49, %v864_v52  ;;  %v2101_v37 = vmul.f32 %v1961_v50, %v760_v14  ;;  %v2104_v4 = vmul.f32 %v1933_v40, %v752_v11  ;;  %v2107_v15 = vmul.f32 %v1938_v41, %v856_v17 }
  0xba   : > { %v829_v18 = vadd.f32 %v813_v19, %v796_v1  ;;  %v2110_v23 = vmul.f32 %v1964_v51, %v864_v52  ;;  %v2114_v56 = vmul.f32 %v1940_v42, %v2060_v6  ;;  %v2119_v19 = vmul.f32 %v1942_v43, %v2060_v6  ;;  %v2121_v14 = vpop.f32.mrf.mxu2 }
  0xbb   : > { %2610 = vst [vmem:[#allocation24_spill] sm:$0xff] %v2101_v37  ;;  %v2125_v11 = vmul.f32 %v1944_v44, %v2060_v6  ;;  %v2130_v52 = vmul.f32 %v1940_v42, %v2098_v48  ;;  %v742_v1 = vrot.slane %v579_v53, 7  ;;  %v2135_v54 = vmul.f32 %v1942_v43, %v2098_v48 }
  0xbc   : > { %2611 = vst [vmem:[#allocation25_spill] sm:$0xff] %v2104_v4  ;;  %v897_v16 = vadd.f32 %v881_v59, %v829_v18  ;;  %v2139_v31 = vmul.f32 %v1944_v44, %v2098_v48  ;;  %v736_v59 = vrot.slane %v2121_v14, 7  ;;  %v2164_v3 = vmul.f32 %v1944_v44, %v579_v53 }
  0xbd   : > { %2612 = vst [vmem:[#allocation26_spill] sm:$0xff] %v2107_v15  ;;  %v751_v17 = vsel %vm746_vm4, %v734_v21, %v742_v1  ;;  %v814_v13 = vmul.f32 %v1940_v42, %v2121_v14  ;;  %v840_v60 = vrot.slane %v2121_v14, 1 }
  0xbe   : > { %2613 = vst [vmem:[#allocation27_spill] sm:$0xff] %v2110_v23  ;;  %v775_v36 = vmul.f32 %v1925_v33, %v751_v17  ;;  %v2618_v23 = vrot.slane %v2014_v12, 1 }
  0xbf   : > { %2614 = vst [vmem:[#allocation28_spill] sm:$0xff] %v2114_v56  ;;  %v2145_v56 = vsel %vm746_vm4, %v742_v1, %v734_v21  ;;  %v811_v21 = vmul.f32 %v1940_v42, %v579_v53  ;;  %v2161_v1 = vmul.f32 %v1942_v43, %v579_v53 }
  0xc0   : > { %2615 = vst [vmem:[#allocation29_spill] sm:$0xff] %v2119_v19  ;;  %v846_v19 = vrot.slane %v579_v53, 1  ;;  %v774_v18 = vmul.f32 %v1948_v45, %v2145_v56  ;;  %v2624_v53 = vrot.slane %v1971_v57, 7 }
  0xc1   : > { %2616 = vst [vmem:[#allocation30_spill] sm:$0xff] %v2135_v54 }
  0xc2   : > { %2617 = vst [vmem:[#allocation31_spill] sm:$0xff] %v2139_v31  ;;  %v855_v15 = vsel %vm850_vm5, %v2618_v23, %v846_v19  ;;  %v2619_v31 = vmov %v2618_v23  ;;  %v793_v4 = vadd.f32 %v2012_v10, %v774_v18  ;;  %v794_v23 = vadd.f32 %v2012_v10, %v775_v36 }
  0xc3   : > { %v863_v63 = vsel %vm850_vm5, %v846_v19, %v2619_v31  ;;  %2620 = vst [vmem:[#allocation32_spill] sm:$0xff] %v2161_v1  ;;  %v878_v12 = vmul.f32 %v1927_v34, %v855_v15  ;;  %v2173_v31 = vmul.f32 %v1929_v35, %v751_v17  ;;  %v2176_v19 = vmul.f32 %v1931_v39, %v855_v15 }
  0xc4   : > { %2621 = vst [vmem:[#allocation33_spill] sm:$0xff] %v2164_v3  ;;  %v879_v37 = vmul.f32 %v1952_v46, %v863_v63  ;;  %v753_v3 = vsel %vm746_vm4, %v736_v59, %v2624_v53  ;;  %v2625_v62 = vmov %v2624_v53  ;;  %v826_v18 = vadd.f32 %v2036_v22, %v793_v4 }
  0xc5   : > { %2622 = vst [vmem:[#allocation34_spill] sm:$0xff] %v2173_v31  ;;  %v761_v36 = vsel %vm746_vm4, %v2625_v62, %v736_v59  ;;  %v827_v1 = vadd.f32 %v811_v21, %v794_v23  ;;  %v779_v61 = vmul.f32 %v1925_v33, %v753_v3  ;;  %v2190_v31 = vmul.f32 %v1958_v49, %v863_v63 }
  0xc6   : > { %2623 = vst [vmem:[#allocation35_spill] sm:$0xff] %v2176_v19  ;;  %v778_v24 = vmul.f32 %v1948_v45, %v761_v36  ;;  %v828_v19 = vadd.f32 %v1987_v0, %v795_v7  ;;  %v963_v53 = vmul.f32 %v1955_v47, %v761_v36  ;;  %v894_v58 = vadd.f32 %v878_v12, %v826_v18 }
  0xc7   : > { %2626 = vst [vmem:[#allocation36_spill] sm:$0xff] %v2190_v31  ;;  %v895_v54 = vadd.f32 %v879_v37, %v827_v1  ;;  %v964_v4 = vmul.f32 %v1929_v35, %v753_v3  ;;  %v2198_v22 = vmul.f32 %v1933_v40, %v751_v17  ;;  %v2628_v59 = vrot.slane %v1971_v57, 1 }
  0xc8   : > { %v797_v62 = vadd.f32 %v2012_v10, %v778_v24  ;;  %v896_v23 = vadd.f32 %v880_v38, %v828_v19  ;;  %v2209_v24 = vmul.f32 %v1938_v41, %v855_v15  ;;  %v798_v1 = vadd.f32 %v2012_v10, %v779_v61 }
  0xc9   : > { %2627 = vst [vmem:[#allocation37_spill] sm:$0xff] %v2198_v22  ;;  %v857_v21 = vsel %vm850_vm5, %v840_v60, %v2628_v59  ;;  %v2629_v0 = vmov %v2628_v59  ;;  %v978_v37 = vadd.f32 %v962_v27, %v895_v54  ;;  %v977_v18 = vadd.f32 %v2088_v55, %v894_v58  ;;  %v597_v59 = vpop.f32.mrf.mxu3 }
  0xca   : > { %v865_v7 = vsel %vm850_vm5, %v2629_v0, %v840_v60  ;;  %v830_v17 = vadd.f32 %v814_v13, %v797_v62  ;;  %v882_v12 = vmul.f32 %v1927_v34, %v857_v21  ;;  %v979_v31 = vadd.f32 %v963_v53, %v896_v23 }
  0xcb   : > { %v996_v57 = vmul.f32 %v1942_v43, %v2121_v14  ;;  %v1011_v22 = vadd.f32 %v2074_v20, %v978_v37  ;;  %v2218_v60 = vmul.f32 %v1964_v51, %v863_v63  ;;  %v883_v54 = vmul.f32 %v1952_v46, %v865_v7 }
  0xcc   : > { %v980_v38 = vadd.f32 %v964_v4, %v897_v16  ;;  %v2222_v61 = vadd.f32 %v882_v12, %v830_v17  ;;  %v1010_v13 = vadd.f32 %v1990_v2, %v977_v18  ;;  %v1063_v55 = vmul.f32 %v1931_v39, %v857_v21 }
  0xcd   : > { %v1064_v58 = vmul.f32 %v1958_v49, %v865_v7  ;;  %v1078_v27 = vadd.f32 %v2096_v30, %v1011_v22  ;;  %v1012_v15 = vadd.f32 %v996_v57, %v979_v31  ;;  %v1146_v20 = vmul.f32 %v1933_v40, %v753_v3 }
  0xce   : > { %v745_v63 = vrot.slane %v597_v59, 7  ;;  %v1077_v19 = vadd.f32 %v2093_v29, %v1010_v13  ;;  %v1145_v53 = vmul.f32 %v1961_v50, %v761_v36  ;;  %v1178_v16 = vmul.f32 %v1944_v44, %v2121_v14 }
  0xcf   : > { %v831_v62 = vadd.f32 %v1998_v5, %v798_v1  ;;  %v1162_v2 = vadd.f32 %v1146_v20, %v1078_v27  ;;  %v2630_v4 = vrot.slane %v2060_v6, 7  ;;  %v849_v31 = vrot.slane %v597_v59, 1 }
  0xd0   : > { %v1161_v36 = vadd.f32 %v1145_v53, %v1077_v19  ;;  %v1245_v22 = vmul.f32 %v1938_v41, %v857_v21  ;;  %v1079_v0 = vadd.f32 %v1063_v55, %v1012_v15  ;;  %v1246_v37 = vmul.f32 %v1964_v51, %v865_v7  ;;  %v567_v55 = vpop.f32.mrf.mxu0 }
  0xd1   : > { %v754_v30 = vsel %vm746_vm4, %v2630_v4, %v745_v63  ;;  %v2631_v3 = vmov %v2630_v4  ;;  %v899_v5 = vadd.f32 %v883_v54, %v831_v62  ;;  %v1195_v23 = vadd.f32 %v2007_v9, %v1162_v2 }
  0xd2   : > { %v762_v29 = vsel %vm746_vm4, %v745_v63, %v2631_v3  ;;  %v781_v14 = vmul.f32 %v1925_v33, %v754_v30  ;;  %v817_v1 = vmul.f32 %v1940_v42, %v597_v59  ;;  %v1194_v17 = vadd.f32 %v1178_v16, %v1161_v36 }
  0xd3   : > { %v2250_v12 = vmul.f32 %v1948_v45, %v762_v29  ;;  %v966_v57 = vmul.f32 %v1929_v35, %v754_v30  ;;  %v1262_v13 = vadd.f32 %v1246_v37, %v1195_v23  ;;  %v2632_v21 = vrot.slane %v2060_v6, 1 }
  0xd4   : > { %v800_v18 = vadd.f32 %v2012_v10, %v781_v14  ;;  %v1013_v9 = vadd.f32 %v2003_v8, %v980_v38  ;;  %v1147_v7 = vmul.f32 %v1961_v50, %v762_v29  ;;  %v1261_v27 = vadd.f32 %v1245_v22, %v1194_v17 }
  0xd5   : > { %v2258_v54 = vsel %vm850_vm5, %v2632_v21, %v849_v31  ;;  %v2633_v15 = vmov %v2632_v21  ;;  %v2269_v63 = vmul.f32 %v1955_v47, %v762_v29  ;;  %v982_v19 = vadd.f32 %v966_v57, %v899_v5  ;;  %1278 = vst [vmem:[%s2271_s17 + $0x48] sm:$0xff] %v1262_v13 }
  0xd6   : > { %v2266_v20 = vsel %vm850_vm5, %v849_v31, %v2633_v15  ;;  %v999_v8 = vmul.f32 %v1942_v43, %v597_v59  ;;  %v1080_v38 = vadd.f32 %v1064_v58, %v1013_v9  ;;  %v1148_v53 = vmul.f32 %v1933_v40, %v754_v30  ;;  %1277 = vst [vmem:[%s2271_s17 + $0x40] sm:$0xff] %v1261_v27 }
  0xd7   : > { %v1163_v16 = vadd.f32 %v1147_v7, %v1079_v0  ;;  %v2277_v6 = vadd.f32 %v817_v1, %v800_v18  ;;  %v1181_v62 = vmul.f32 %v1944_v44, %v597_v59  ;;  %v740_v2 = vrot.slane %v567_v55, 7 }
  0xd8   : > { %v844_v4 = vrot.slane %v567_v55, 1  ;;  %v1164_v3 = vadd.f32 %v1148_v53, %v1080_v38  ;;  %v1247_v31 = vmul.f32 %v1938_v41, %v2258_v54  ;;  %v1248_v58 = vmul.f32 %v1964_v51, %v2266_v20 }
  0xd9   : > { %v1196_v29 = vadd.f32 %v2125_v11, %v1163_v16  ;;  %v2285_v36 = vadd.f32 %v999_v8, %v982_v19  ;;  %v2635_v30 = vrot.slane %v2098_v48, 7  ;;  %v2637_v11 = vrot.slane %v2098_v48, 1  ;;  %v2314_v48 = vpop.f32.mrf.mxu1 }
  0xda   : > { %v1197_v0 = vadd.f32 %v1181_v62, %v1164_v3  ;;  %v807_v1 = vmul.f32 %v1940_v42, %v567_v55  ;;  %v989_v13 = vmul.f32 %v1942_v43, %v567_v55  ;;  %v2308_v21 = vmul.f32 %v1944_v44, %v567_v55  ;;  %v2322_v55 = vpop.f32.mrf.mxu3  ;;  %v570_v3 = vpop.f32.mrf.mxu0 }
  0xdb   : > { %2634 = vst [vmem:[#allocation38_spill] sm:$0xff] %v2285_v36  ;;  %v749_v22 = vsel %vm746_vm4, %v2635_v30, %v740_v2  ;;  %v2636_v59 = vmov %v2635_v30  ;;  %v861_v5 = vsel %vm850_vm5, %v844_v4, %v2637_v11  ;;  %v1263_v23 = vadd.f32 %v1247_v31, %v1196_v29  ;;  %v2649_v29 = vld [vmem:[#allocation30_spill] sm:$0xff] }
  0xdc   : > { %v757_v14 = vsel %vm746_vm4, %v740_v2, %v2636_v59  ;;  %v771_v37 = vmul.f32 %v1925_v33, %v749_v22  ;;  %v2638_v17 = vmov %v2637_v11  ;;  %v956_v57 = vmul.f32 %v1929_v35, %v749_v22  ;;  %2639 = vst [vmem:[#allocation39_spill] sm:$0xff] %v2308_v21  ;;  %v2650_v21 = vld [vmem:[#allocation12_spill] sm:$0xff] }
  0xdd   : > { %v853_v18 = vsel %vm850_vm5, %v2638_v17, %v844_v4  ;;  %v1264_v9 = vadd.f32 %v1248_v58, %v1197_v0  ;;  %1279 = vst [vmem:[%s2271_s17 + $0x50] sm:$0xff] %v1263_v23  ;;  %v770_v7 = vmul.f32 %v1948_v45, %v757_v14  ;;  %v875_v15 = vmul.f32 %v1952_v46, %v861_v5 }
  0xde   : > { %v790_v27 = vadd.f32 %v2012_v10, %v771_v37  ;;  %v955_v19 = vmul.f32 %v1955_v47, %v757_v14  ;;  %v972_v8 = vadd.f32 %v956_v57, %v2078_v26  ;;  %v1056_v38 = vmul.f32 %v1958_v49, %v861_v5 }
  0xdf   : > { %v2320_v53 = vmul.f32 %v1961_v50, %v757_v14  ;;  %1280 = vst [vmem:[%s2271_s17 + $0x58] sm:$0xff] %v1264_v9  ;;  %v2326_v62 = vmul.f32 %v1933_v40, %v749_v22  ;;  %v2329_v2 = vmul.f32 %v1938_v41, %v853_v18  ;;  %v2332_v4 = vmul.f32 %v1964_v51, %v861_v5 }
  0xe0   : > { %v823_v16 = vadd.f32 %v807_v1, %v790_v27  ;;  %v1005_v26 = vadd.f32 %v989_v13, %v972_v8  ;;  %v2337_v31 = vmul.f32 %v1940_v42, %v2314_v48  ;;  %v2343_v59 = vmul.f32 %v1942_v43, %v2322_v55 }
  0xe1   : > { %2640 = vst [vmem:[#allocation40_spill] sm:$0xff] %v2320_v53  ;;  %v733_v5 = vrot.slane %v570_v3, 7  ;;  %v789_v0 = vadd.f32 %v2012_v10, %v770_v7  ;;  %v808_v23 = vmul.f32 %v1940_v42, %v570_v3  ;;  %v837_v37 = vrot.slane %v570_v3, 1 }
  0xe2   : > { %2641 = vst [vmem:[#allocation41_spill] sm:$0xff] %v2326_v62  ;;  %v891_v30 = vadd.f32 %v875_v15, %v823_v16  ;;  %v1072_v11 = vadd.f32 %v1056_v38, %v1005_v26  ;;  %v874_v1 = vmul.f32 %v1927_v34, %v853_v18  ;;  %v959_v17 = vmul.f32 %v1955_v47, %v2145_v56 }
  0xe3   : > { %2642 = vst [vmem:[#allocation42_spill] sm:$0xff] %v2329_v2  ;;  %v971_v57 = vadd.f32 %v955_v19, %v2076_v25  ;;  %v2645_v13 = vrot.slane %v1923_v32, 7  ;;  %v822_v15 = vadd.f32 %v2130_v52, %v789_v0  ;;  %v990_v8 = vmul.f32 %v1942_v43, %v570_v3 }
  0xe4   : > { %2643 = vst [vmem:[#allocation43_spill] sm:$0xff] %v2332_v4  ;;  %v2647_v25 = vrot.slane %v1923_v32, 1  ;;  %v1055_v32 = vmul.f32 %v1931_v39, %v853_v18  ;;  %v2651_v18 = vld [vmem:[#allocation13_spill] sm:$0xff]  ;;  %v1172_v53 = vmul.f32 %v1944_v44, %v570_v3 }
  0xe5   : > { %2644 = vst [vmem:[#allocation44_spill] sm:$0xff] %v2343_v59  ;;  %v750_v9 = vsel %vm746_vm4, %v733_v5, %v2645_v13  ;;  %v2646_v27 = vmov %v2645_v13  ;;  %v890_v0 = vadd.f32 %v874_v1, %v822_v15  ;;  %v654_v59 = vpop.f32.mrf.mxu1 }
  0xe6   : > { %v758_v7 = vsel %vm746_vm4, %v2646_v27, %v733_v5  ;;  %v773_v16 = vmul.f32 %v1925_v33, %v750_v9  ;;  %v854_v19 = vsel %vm850_vm5, %v837_v37, %v2647_v25  ;;  %v2648_v26 = vmov %v2647_v25 }
  0xe7   : > { %v772_v38 = vmul.f32 %v1948_v45, %v758_v7  ;;  %v862_v13 = vsel %vm850_vm5, %v2648_v26, %v837_v37  ;;  %v876_v5 = vmul.f32 %v1927_v34, %v854_v19  ;;  %v957_v27 = vmul.f32 %v1955_v47, %v758_v7 }
  0xe8   : > { %v877_v52 = vmul.f32 %v1952_v46, %v862_v13  ;;  %v792_v22 = vadd.f32 %v2012_v10, %v773_v16  ;;  %v958_v58 = vmul.f32 %v1929_v35, %v750_v9  ;;  %v1004_v25 = vadd.f32 %v2649_v29, %v971_v57 }
  0xe9   : > { %v791_v14 = vadd.f32 %v2012_v10, %v772_v38  ;;  %v973_v4 = vadd.f32 %v957_v27, %v890_v0  ;;  %v1057_v37 = vmul.f32 %v1931_v39, %v854_v19  ;;  %v1058_v26 = vmul.f32 %v1958_v49, %v862_v13 }
  0xea   : > { %v825_v1 = vadd.f32 %v2650_v21, %v792_v22  ;;  %v974_v15 = vadd.f32 %v958_v58, %v891_v30  ;;  %v1139_v36 = vmul.f32 %v1961_v50, %v758_v7  ;;  %v1071_v62 = vadd.f32 %v1055_v32, %v1004_v25  ;;  %v2654_v25 = vld [vmem:[#allocation18_spill] sm:$0xff]  ;;  %v2655_v32 = vld [vmem:[#allocation32_spill] sm:$0xff] }
  0xeb   : > { %v824_v2 = vadd.f32 %v808_v23, %v791_v14  ;;  %v1006_v38 = vadd.f32 %v990_v8, %v973_v4  ;;  %v1140_v16 = vmul.f32 %v1933_v40, %v750_v9  ;;  %v1141_v29 = vmul.f32 %v1961_v50, %v2145_v56  ;;  %v2652_v4 = vld [vmem:[#allocation34_spill] sm:$0xff] }
  0xec   : > { %v893_v0 = vadd.f32 %v877_v52, %v825_v1  ;;  %v1007_v27 = vadd.f32 %v2651_v18, %v974_v15  ;;  %v1155_v23 = vadd.f32 %v1139_v36, %v1071_v62  ;;  %v1239_v58 = vmul.f32 %v1938_v41, %v854_v19  ;;  %v2656_v36 = vld [vmem:[#allocation37_spill] sm:$0xff]  ;;  %v2659_v15 = vld [vmem:[#allocation35_spill] sm:$0xff] }
  0xed   : > { %v892_v57 = vadd.f32 %v876_v5, %v824_v2  ;;  %v1073_v14 = vadd.f32 %v1057_v37, %v1006_v38  ;;  %v1156_v21 = vadd.f32 %v1140_v16, %v1072_v11  ;;  %v1240_v9 = vmul.f32 %v1964_v51, %v862_v13  ;;  %v2653_v2 = vld [vmem:[#allocation14_spill] sm:$0xff]  ;;  %v2660_v16 = vld [vmem:[#allocation36_spill] sm:$0xff] }
  0xee   : > { %v976_v22 = vadd.f32 %v2652_v4, %v893_v0  ;;  %v1074_v7 = vadd.f32 %v1058_v26, %v1007_v27  ;;  %v1188_v56 = vadd.f32 %v1172_v53, %v1155_v23  ;;  %v738_v52 = vrot.slane %v654_v59, 7  ;;  %v2664_v4 = vld [vmem:[#allocation25_spill] sm:$0xff] }
  0xef   : > { %v975_v30 = vadd.f32 %v959_v17, %v892_v57  ;;  %v1157_v8 = vadd.f32 %v1141_v29, %v1073_v14  ;;  %v1189_v5 = vadd.f32 %v2653_v2, %v1156_v21  ;;  %v803_v11 = vmul.f32 %v1940_v42, %v654_v59  ;;  %v2657_v17 = vld [vmem:[#allocation22_spill] sm:$0xff]  ;;  %v2661_v57 = vld [vmem:[#allocation33_spill] sm:$0xff] }
  0xf0   : > { %v1009_v37 = vadd.f32 %v2655_v32, %v976_v22  ;;  %v1158_v62 = vadd.f32 %v2656_v36, %v1074_v7  ;;  %v1255_v26 = vadd.f32 %v1239_v58, %v1188_v56  ;;  %v2658_v13 = vrot.slane %v2314_v48, 7  ;;  %v2663_v58 = vld [vmem:[#allocation24_spill] sm:$0xff]  ;;  %v2437_v36 = vpop.f32.mrf.mxu2 }
  0xf1   : > { %v1008_v3 = vadd.f32 %v2654_v25, %v975_v30  ;;  %v1190_v19 = vadd.f32 %v2657_v17, %v1157_v8  ;;  %v1256_v1 = vadd.f32 %v1240_v9, %v1189_v5  ;;  %v842_v21 = vrot.slane %v654_v59, 1  ;;  %v2665_v9 = vld [vmem:[#allocation16_spill] sm:$0xff]  ;;  %v2668_v5 = vld [vmem:[#allocation15_spill] sm:$0xff] }
  0xf2   : > { %v747_v53 = vsel %vm746_vm4, %v2658_v13, %v738_v52  ;;  %v1076_v29 = vadd.f32 %v2660_v16, %v1009_v37  ;;  %v1191_v0 = vadd.f32 %v2661_v57, %v1158_v62  ;;  %v2662_v18 = vmov %v2658_v13  ;;  %1271 = vst [vmem:[%s2271_s17 + $0x10] sm:$0xff] %v1255_v26  ;;  %v2669_v25 = vld [vmem:[#allocation23_spill] sm:$0xff]  ;;  %v2670_v26 = vld [vmem:[#allocation26_spill] sm:$0xff] }
  0xf3   : > { %v1075_v38 = vadd.f32 %v2659_v15, %v1008_v3  ;;  %v755_v42 = vsel %vm746_vm4, %v738_v52, %v2662_v18  ;;  %v1257_v27 = vadd.f32 %v2209_v24, %v1190_v19  ;;  %v767_v23 = vmul.f32 %v1925_v33, %v747_v53  ;;  %1272 = vst [vmem:[%s2271_s17 + $0x18] sm:$0xff] %v1256_v1  ;;  %v2671_v13 = vld [vmem:[#allocation27_spill] sm:$0xff] }
  0xf4   : > { %v766_v14 = vmul.f32 %v1948_v45, %v755_v42  ;;  %v1160_v22 = vadd.f32 %v2664_v4, %v1076_v29  ;;  %v1258_v7 = vadd.f32 %v2218_v60, %v1191_v0  ;;  %v954_v8 = vmul.f32 %v1929_v35, %v2665_v9  ;;  %v2430_v60 = vpop.f32.mrf.mxu3  ;;  %v2675_v42 = vld [vmem:[#allocation19_spill] sm:$0xff] }
  0xf5   : > { %v1159_v30 = vadd.f32 %v2663_v58, %v1075_v38  ;;  %1273 = vst [vmem:[%s2271_s17 + $0x20] sm:$0xff] %v1257_v27  ;;  %v786_v56 = vadd.f32 %v2012_v10, %v767_v23  ;;  %v2666_v45 = vrot.slane %v2314_v48, 1  ;;  %v799_v17 = vadd.f32 %v2012_v10, %v2250_v12  ;;  %v2677_v4 = vld [vmem:[#allocation11_spill] sm:$0xff] }
  0xf6   : > { %v785_v24 = vadd.f32 %v2012_v10, %v766_v14  ;;  %v1193_v3 = vadd.f32 %v2669_v25, %v1160_v22  ;;  %1274 = vst [vmem:[%s2271_s17 + $0x28] sm:$0xff] %v1258_v7  ;;  %v884_v19 = vmul.f32 %v1927_v34, %v2258_v54  ;;  %v885_v15 = vmul.f32 %v1952_v46, %v2266_v20  ;;  %v2678_v7 = vld [vmem:[#allocation17_spill] sm:$0xff]  ;;  %v2683_v25 = vld [vmem:[#allocation44_spill] sm:$0xff] }
  0xf7   : > { %v851_v33 = vsel %vm850_vm5, %v2666_v45, %v842_v21  ;;  %v2667_v59 = vmov %v2666_v45  ;;  %v1192_v52 = vadd.f32 %v2668_v5, %v1159_v30  ;;  %v819_v48 = vadd.f32 %v803_v11, %v786_v56  ;;  %v2682_v5 = vld [vmem:[#allocation21_spill] sm:$0xff] }
  0xf8   : > { %v859_v2 = vsel %vm850_vm5, %v842_v21, %v2667_v59  ;;  %v870_v32 = vmul.f32 %v1927_v34, %v851_v33  ;;  %v818_v62 = vadd.f32 %v2337_v31, %v785_v24  ;;  %v1260_v53 = vadd.f32 %v2671_v13, %v1193_v3  ;;  %v2672_v31 = vld [vmem:[#allocation28_spill] sm:$0xff]  ;;  %v2676_v21 = vld [vmem:[#allocation29_spill] sm:$0xff] }
  0xf9   : > { %v871_v37 = vmul.f32 %v1952_v46, %v859_v2  ;;  %v1259_v1 = vadd.f32 %v2670_v26, %v1192_v52  ;;  %v933_v38 = vrot.slane %v2430_v60, 7  ;;  %v832_v11 = vadd.f32 %v2672_v31, %v799_v17  ;;  %v2681_v59 = vld [vmem:[#allocation20_spill] sm:$0xff]  ;;  %v2686_v26 = vld [vmem:[#allocation38_spill] sm:$0xff] }
  0xfa   : > { %v886_v16 = vadd.f32 %v870_v32, %v818_v62  ;;  %v981_v57 = vadd.f32 %v2269_v63, %v2222_v61  ;;  %v1182_v10 = vmul.f32 %v1944_v44, %v2322_v55  ;;  %v901_v34 = vadd.f32 %v885_v15, %v2277_v6  ;;  %1276 = vst [vmem:[%s2271_s17 + $0x38] sm:$0xff] %v1260_v53  ;;  %v690_v53 = vpop.f32.mrf.mxu2 }
  0xfb   : > { %v887_v29 = vadd.f32 %v871_v37, %v819_v48  ;;  %1275 = vst [vmem:[%s2271_s17 + $0x30] sm:$0xff] %v1259_v1  ;;  %v2673_v12 = vrot.slane %v2322_v55, 7  ;;  %v900_v63 = vadd.f32 %v884_v19, %v832_v11  ;;  %v1001_v6 = vmul.f32 %v1942_v43, %v2430_v60  ;;  %v2684_v48 = vld [vmem:[#allocation40_spill] sm:$0xff]  ;;  %v2685_v19 = vld [vmem:[#allocation41_spill] sm:$0xff] }
  0xfc   : > { %v969_v27 = vadd.f32 %v2675_v42, %v886_v16  ;;  %v1014_v58 = vadd.f32 %v2676_v21, %v981_v57  ;;  %v1033_v30 = vrot.slane %v2430_v60, 1  ;;  %v1066_v33 = vmul.f32 %v1958_v49, %v2266_v20  ;;  %v2689_v42 = vld [vmem:[#allocation42_spill] sm:$0xff] }
  0xfd   : > { %v941_v46 = vsel %vm746_vm4, %v2673_v12, %v933_v38  ;;  %v2674_v0 = vmov %v2673_v12  ;;  %v970_v61 = vadd.f32 %v954_v8, %v887_v29  ;;  %v1065_v8 = vmul.f32 %v1931_v39, %v2258_v54 }
  0xfe   : > { %v949_v18 = vsel %vm746_vm4, %v933_v38, %v2674_v0  ;;  %v968_v23 = vmul.f32 %v1929_v35, %v941_v46  ;;  %v1002_v22 = vadd.f32 %v2677_v4, %v969_v27  ;;  %v2679_v35 = vrot.slane %v2322_v55, 1 }
  0xff   : > { %v967_v14 = vmul.f32 %v1955_v47, %v949_v18  ;;  %v1003_v9 = vadd.f32 %v2678_v7, %v970_v61  ;;  %v1081_v3 = vadd.f32 %v1065_v8, %v1014_v58  ;;  %v1149_v62 = vmul.f32 %v1961_v50, %v949_v18  ;;  %v2690_v61 = vld [vmem:[#allocation43_spill] sm:$0xff] }
 0x100   : > { %v984_v47 = vadd.f32 %v968_v23, %v901_v34  ;;  %v1041_v56 = vsel %vm850_vm5, %v2679_v35, %v1033_v30  ;;  %v2680_v43 = vmov %v2679_v35  ;;  %v1069_v2 = vadd.f32 %v2681_v59, %v1002_v22 }
 0x101   : > { %v983_v24 = vadd.f32 %v967_v14, %v900_v63  ;;  %v1049_v45 = vsel %vm850_vm5, %v1033_v30, %v2680_v43  ;;  %v1070_v52 = vadd.f32 %v2682_v5, %v1003_v9  ;;  %v1067_v37 = vmul.f32 %v1931_v39, %v1041_v56  ;;  %v2687_v39 = vld [vmem:[#allocation31_spill] sm:$0xff] }
 0x102   : > { %v1017_v32 = vadd.f32 %v1001_v6, %v984_v47  ;;  %v1068_v55 = vmul.f32 %v1958_v49, %v1049_v45  ;;  %v1153_v17 = vadd.f32 %v2684_v48, %v1069_v2  ;;  %v1082_v1 = vadd.f32 %v1066_v33, %v2686_v26  ;;  %v2688_v49 = vld [vmem:[#allocation39_spill] sm:$0xff] }
 0x103   : > { %v1016_v54 = vadd.f32 %v2683_v25, %v983_v24  ;;  %v1154_v20 = vadd.f32 %v2685_v19, %v1070_v52  ;;  %v1150_v13 = vmul.f32 %v1933_v40, %v941_v46  ;;  %v1109_v15 = vrot.slane %v2437_v36, 7 }
 0x104   : > { %v1084_v16 = vadd.f32 %v1068_v55, %v1017_v32  ;;  %v1165_v29 = vadd.f32 %v1149_v62, %v1081_v3  ;;  %v1186_v31 = vadd.f32 %v2687_v39, %v1153_v17  ;;  %v1183_v34 = vmul.f32 %v1944_v44, %v2430_v60 }
 0x105   : > { %v1083_v38 = vadd.f32 %v1067_v37, %v1016_v54  ;;  %v1187_v11 = vadd.f32 %v2688_v49, %v1154_v20  ;;  %v1166_v57 = vadd.f32 %v1150_v13, %v1082_v1  ;;  %v1249_v0 = vmul.f32 %v1938_v41, %v1041_v56 }
 0x106   : > { %v1198_v12 = vadd.f32 %v1182_v10, %v1165_v29  ;;  %v1117_v46 = vrot.slane %v690_v53, 7  ;;  %v1217_v18 = vrot.slane %v690_v53, 1  ;;  %v1253_v27 = vadd.f32 %v2689_v42, %v1186_v31 }
 0x107   : > { %v1254_v63 = vadd.f32 %v2690_v61, %v1187_v11  ;;  %v1199_v14 = vadd.f32 %v1183_v34, %v1166_v57  ;;  %v1250_v23 = vmul.f32 %v1964_v51, %v1049_v45  ;;  %v1209_v6 = vrot.slane %v2437_v36, 1 }
 0x108   : > { %v1265_v21 = vadd.f32 %v1249_v0, %v1198_v12  ;;  %v1125_v60 = vsel %vm746_vm4, %v1109_v15, %v1117_v46  ;;  %v1133_v10 = vsel %vm746_vm4, %v1117_v46, %v1109_v15  ;;  %1269 = vst [vmem:[%s2271_s17] sm:$0xff] %v1253_v27  ;;  %v1184_v9 = vmul.f32 %v1944_v44, %v2437_v36 }
 0x109   : > { %v1266_v58 = vadd.f32 %v1250_v23, %v1199_v14  ;;  %v1151_v30 = vmul.f32 %v1961_v50, %v1133_v10  ;;  %v1152_v4 = vmul.f32 %v1933_v40, %v1125_v60  ;;  %1270 = vst [vmem:[%s2271_s17 + $0x8] sm:$0xff] %v1254_v63  ;;  %v1225_v22 = vsel %vm850_vm5, %v1209_v6, %v1217_v18 }
 0x10a   : > { %v1233_v7 = vsel %vm850_vm5, %v1217_v18, %v1209_v6  ;;  %1281 = vst [vmem:[%s2271_s17 + $0x60] sm:$0xff] %v1265_v21  ;;  %v1185_v24 = vmul.f32 %v1944_v44, %v690_v53  ;;  %v1251_v47 = vmul.f32 %v1938_v41, %v1225_v22 }
 0x10b   : > { %v1167_v50 = vadd.f32 %v1151_v30, %v1083_v38  ;;  %v1168_v40 = vadd.f32 %v1152_v4, %v1084_v16  ;;  %1282 = vst [vmem:[%s2271_s17 + $0x68] sm:$0xff] %v1266_v58  ;;  %v1252_v35 = vmul.f32 %v1964_v51, %v1233_v7 }
 0x10d   : > { %v1200_v8 = vadd.f32 %v1184_v9, %v1167_v50  ;;  %v1201_v28 = vadd.f32 %v1185_v24, %v1168_v40 }
 0x10f   : > { %v1267_v56 = vadd.f32 %v1251_v47, %v1200_v8  ;;  %v1268_v36 = vadd.f32 %v1252_v35, %v1201_v28 }
 0x111   : > { %1283 = vst [vmem:[%s2271_s17 + $0x70] sm:$0xff] %v1267_v56 }
 0x112   : > { %1284 = vst [vmem:[%s2271_s17 + $0x78] sm:$0xff] %v1268_v36 }
 0x113   : > { %1661 = shalt.err (!%p1658_p13)
}
 0x114   : > { %s1731_s15 = smov 128   ;;  %s1732_s30 = smov 8  }
 0x115   : > { %1558 = dma.vmem_to_hbm [thread:$0]  (%p1819_p3), %s1303_s14, 2048, %s1305_s16, %s1286_s12, %s1731_s15, %s1731_s15, %s1732_s30  }
 0x116 PF: > { %p1564_p0 = scmp.ge.s32.totalorder %s1728_s28, 2  ;;  %s1319_s17 = sand.u32 1, %s1700_s21  }
 0x117   : > { %s1320_s20 = scalar_lea.sflag [#allocation4], %s1319_s17 }
 0x118   : > { %p1561_p1 = pnand %p1564_p0, %p1828_p8 }
 0x11a   : > { %p1562_p2 = pneg %p1561_p1 }
 0x11c   : > { %1695 = dma.done.wait (%p1562_p2), %s1320_s20, 2048  }
 0x11d   : > { %1697 = vsyncadd (%p1562_p2), %s1320_s20, 4294965248  ;;  %s19_s28 = sadd.s32 1, %s1728_s28   ;;  %s2691_s9 = sld [smem:[#allocation10_spill]] }
 0x11e   : > { %p16_p4 = scmp.ge.s32.totalorder %s19_s28, 6   ;;  %s2692_s24 = sld [smem:[#allocation6_spill]] }
 0x11f   : > { %s2693_s25 = sld [smem:[#allocation7_spill]]  ;;  %s2696_s21 = smov %s1704_s22 }
 0x120   : > { %s2694_s26 = sld [smem:[#allocation8_spill]]  ;;  %s2697_s22 = smov %s1708_s23 }
 0x121   : > { %s2695_s27 = sld [smem:[#allocation9_spill]]  ;;  %18 = sbr.rel (!%p16_p4) target bundleno = 8 (0x8), region = 97 }
 0x123   : > { %s2698_s23 = smov %s2691_s9 }
 0x126   :  { %1326 = vsyncpa [#allocation4], 1 }
 0x127   :  { %1328 = vsyncpa [#allocation4 + $0x1], 1 }

</bundles_post_ra>
